<compile_context>
chip_gen: v6e
topology: v6e:2x2x1
jax: 0.10.0
libtpu: 0.0.40
codegen_flags: <defaults>
</compile_context>

<pallas_src>
import functools

import jax
import jax.numpy as jnp
from jax import lax
from jax.experimental import pallas as pl
from jax.experimental.pallas import tpu as pltpu

_NORM_EPS = 1e-12            # F.normalize default eps (x / max(||x||, eps))
_NORM_EPS_SQ = _NORM_EPS * _NORM_EPS


def _infonce_kernel(q0_ref, q1_ref, k1_ref, k0_ref, out_ref, kn1_sc, kn0_sc, *,
                    inv_temp, n_valid, n_pad, tile_rows, tiles_per_split,
                    use_row_max):
    """Grid = (core_split, q_tile). Pair 0 = (q0, k1), pair 1 = (q1, k0)."""
    h = pl.program_id(0)     # core split ("parallel": maps onto v7x's 2 TCs)
    j = pl.program_id(1)     # query tile within the split ("arbitrary")

    # --- once per core: normalize + bf16-cast the resident key sets ----------
    # Chunked so the f32 temporaries stay O(tile*C), not O(N*C). On single-TC
    # chips (v5e/v6e) this simply reruns per split value — a one-off O(N*C)
    # VPU pass, negligible next to the O(N^2*C) matmuls.
    @pl.when(j == 0)
    def _prepare_keys():
        def chunk(t, carry):
            rs = pl.multiple_of(t * tile_rows, tile_rows)
            for k_ref, kn_sc in ((k1_ref, kn1_sc), (k0_ref, kn0_sc)):
                kf = k_ref[pl.ds(rs, tile_rows), :].astype(jnp.float32)
                ks = lax.rsqrt(jnp.maximum(
                    jnp.sum(kf * kf, axis=-1, keepdims=True), _NORM_EPS_SQ))
                kn_sc[pl.ds(rs, tile_rows), :] = (kf * ks).astype(jnp.bfloat16)
            return carry
        lax.fori_loop(0, n_pad // tile_rows, chunk, 0)

    row_start = pl.multiple_of((h * tiles_per_split + j) * tile_rows, tile_rows)

    def pair_row_loss(q_ref, kn_sc):
        # Normalize the query tile; fold 1/T into the query scale so the MXU
        # output is already the scaled logits. bf16-cast so the matmul runs at
        # native MXU rate (unit-norm rows -> bf16 rounding is harmless for a loss).
        qf = q_ref[...].astype(jnp.float32)
        qs = lax.rsqrt(jnp.maximum(
            jnp.sum(qf * qf, axis=-1, keepdims=True), _NORM_EPS_SQ)) * inv_temp
        qn = (qf * qs).astype(jnp.bfloat16)                       # (TQ, C)
        kn = kn_sc[...]                                           # (N_pad, C) bf16

        # NT contraction over the feature axis — no key transpose materialized.
        s = lax.dot_general(qn, kn, (((1,), (1,)), ((), ())),
                            preferred_element_type=jnp.float32)   # (TQ, N_pad)

        # Positives: K is fully resident, so the matching key rows are the
        # [row_start, row_start + TQ) slice of the normalized-key scratch.
        # Computed from the same bf16 tensors as the matmul (no precision skew).
        kpos = kn_sc[pl.ds(row_start, tile_rows), :].astype(jnp.float32)
        pos = jnp.sum(qn.astype(jnp.float32) * kpos, axis=-1, keepdims=True)

        if n_pad != n_valid:
            # Mask padded key columns out of the softmax denominator.
            col = lax.broadcasted_iota(jnp.int32, s.shape, 1)
            s = jnp.where(col < n_valid, s, -jnp.inf)

        if use_row_max:
            # Only needed when 1/|T| is large enough that exp(f32) could overflow.
            m = jnp.max(s, axis=-1, keepdims=True)
            lse = m + jnp.log(jnp.sum(jnp.exp(s - m), axis=-1, keepdims=True))
        else:
            # |logits| <= 1/|T| (~14.3 at T=0.07): exp cannot overflow, skip max.
            lse = jnp.log(jnp.sum(jnp.exp(s), axis=-1, keepdims=True))
        return lse - pos                                          # (TQ, 1)

    # Per-query-row loss, summed over the two pairs; padded rows sliced outside.
    out_ref[...] = pair_row_loss(q0_ref, kn1_sc) + pair_row_loss(q1_ref, kn0_sc)


def _round_up(x, m):
    return (x + m - 1) // m * m


def infonce_mocov3(out0, out1, temperature=0.07, block_rows=256):
    """out0 = (q0, q1), out1 = (k0, k1); each (N, C). Returns the scalar loss."""
    if abs(temperature) < 1e-8:
        raise ValueError("Illegal temperature: abs({}) < 1e-8".format(temperature))
    if block_rows <= 0 or block_rows % 16 != 0:
        raise ValueError("block_rows must be a positive multiple of 16")

    q0, q1 = out0
    k0, k1 = out1
    n, c = q0.shape

    # --- tiling: pad N up to whole, aligned query tiles (never odd/tiny tiles) ---
    tq = _round_up(n, 16) if n <= block_rows else block_rows
    n_pad = _round_up(n, tq)
    tiles = n_pad // tq
    n_split = 2 if tiles % 2 == 0 else 1        # v7x megacore split of q tiles
    tiles_per_split = tiles // n_split

    if n_pad != n:
        pad = ((0, n_pad - n), (0, 0))
        q0 = jnp.pad(q0, pad); q1 = jnp.pad(q1, pad)
        k0 = jnp.pad(k0, pad); k1 = jnp.pad(k1, pad)

    itemsize = jnp.dtype(q0.dtype).itemsize

    # --- VMEM budget for the K-resident form ---------------------------------
    vmem_est = (
        2 * 2 * n_pad * c * itemsize       # k0, k1 input blocks (double-buffered)
        + 2 * n_pad * c * 2                # bf16 normalized-key scratch
        + 2 * 2 * tq * c * itemsize        # q0, q1 tiles (double-buffered)
        + 4 * tq * n_pad * 4               # logits / exp temporaries (approx)
    )
    if vmem_est > 48 * 1024 * 1024:
        # TODO(synk): stream K in row chunks with an online logsumexp once the
        # resident key set no longer fits VMEM (v7x only has 64 MiB physical).
        raise ValueError("batch too large for the K-resident InfoNCE kernel "
                         "(~{} MiB VMEM needed)".format(vmem_est >> 20))
    # v7x-safe cap; v5e/v6e (128 MiB physical) could raise this further.
    vmem_limit = min(max(32 * 1024 * 1024, vmem_est * 3 // 2), 64 * 1024 * 1024)

    cost = pl.CostEstimate(
        flops=4 * n_pad * n_pad * c,                     # two NxNxC matmuls
        transcendentals=2 * n_pad * n_pad + 6 * n_pad,   # exp + log/rsqrt
        # q0/q1 + per-row output touched once; k0/k1 streamed once per core split.
        bytes_accessed=2 * n_pad * c * (1 + n_split) * itemsize + 4 * n_pad,
    )

    inv_temp = 1.0 / temperature
    kernel = functools.partial(
        _infonce_kernel,
        inv_temp=inv_temp, n_valid=n, n_pad=n_pad, tile_rows=tq,
        tiles_per_split=tiles_per_split,
        use_row_max=abs(inv_temp) > 60.0)   # exp(f32) overflow guard for tiny T

    q_spec = pl.BlockSpec((tq, c), lambda h, j: (h * tiles_per_split + j, 0))
    k_spec = pl.BlockSpec((n_pad, c), lambda h, j: (0, 0))   # resident: one DMA

    per_row = pl.pallas_call(
        kernel,
        out_shape=jax.ShapeDtypeStruct((n_pad, 1), jnp.float32),
        grid=(n_split, tiles_per_split),
        in_specs=[q_spec, q_spec, k_spec, k_spec],
        out_specs=pl.BlockSpec((tq, 1), lambda h, j: (h * tiles_per_split + j, 0)),
        scratch_shapes=[
            pltpu.VMEM((n_pad, c), jnp.bfloat16),   # normalized k1 (pair 0)
            pltpu.VMEM((n_pad, c), jnp.bfloat16),   # normalized k0 (pair 1)
        ],
        compiler_params=pltpu.CompilerParams(
            # Every grid step owns a distinct output block -> the split axis is
            # race-free and may map onto both v7x TensorCores.
            dimension_semantics=("parallel", "arbitrary"),
            vmem_limit_bytes=vmem_limit,
        ),
        cost_estimate=cost,
    )(q0, q1, k1, k0)

    # loss = mean(CE(q0,k1)) + mean(CE(q1,k0)) = sum of per-row terms / N.
    return jnp.sum(per_row[:n, 0]) / n


def _reference(out0, out1, temperature=0.07):
    """Pure-JAX reference mirroring the PyTorch module (f32 throughout)."""
    def one(q, kk):
        qn = q / jnp.maximum(jnp.linalg.norm(q, axis=1, keepdims=True), _NORM_EPS)
        kn = kk / jnp.maximum(jnp.linalg.norm(kk, axis=1, keepdims=True), _NORM_EPS)
        logits = (qn @ kn.T) / temperature
        idx = jnp.arange(logits.shape[0])
        lse = jax.scipy.special.logsumexp(logits, axis=-1)
        return jnp.mean(lse - logits[idx, idx])
    q0, q1 = out0
    k0, k1 = out1
    return one(q0, k1) + one(q1, k0)


if __name__ == "__main__":
    key = jax.random.PRNGKey(0)
    ka, kb, kc, kd = jax.random.split(key, 4)
    C = 128   # projection-head embedding dim

    # Config A: N=64 aligned — multi-tile, core-split path (grid (2, 2), no pad).
    N = 64
    q0 = jax.random.normal(ka, (N, C), dtype=jnp.float32)
    q1 = jax.random.normal(kb, (N, C), dtype=jnp.float32)
    k0 = jax.random.normal(kc, (N, C), dtype=jnp.float32)
    k1 = jax.random.normal(kd, (N, C), dtype=jnp.float32)
    ref = jax.block_until_ready(_reference((q0, q1), (k0, k1)))
    loss = jax.block_until_ready(
        infonce_mocov3((q0, q1), (k0, k1), block_rows=16))
    # bf16 MXU inputs -> loose-but-meaningful tolerance vs. the f32 reference.
    assert jnp.allclose(loss, ref, rtol=2e-2, atol=2e-2), (loss, ref)

    # Config B: N=56 unaligned — exercises padding + key-column masking.
    Nb = 56
    q0b, q1b, k0b, k1b = (a[:Nb] for a in (q0, q1, k0, k1))
    refb = jax.block_until_ready(_reference((q0b, q1b), (k0b, k1b)))
    lossb = jax.block_until_ready(
        infonce_mocov3((q0b, q1b), (k0b, k1b), block_rows=16))
    assert jnp.allclose(lossb, refb, rtol=2e-2, atol=2e-2), (lossb, refb)

    print("KERNEL_OK")
</pallas_src>

<mosaic_0001>
module attributes {stable_mosaic.version = 11 : i64} {
  func.func @_infonce_kernel(%arg0: i32, %arg1: i32, %arg2: memref<16x128xf32, #tpu.memory_space<vmem>>, %arg3: memref<16x128xf32, #tpu.memory_space<vmem>>, %arg4: memref<64x128xf32, #tpu.memory_space<vmem>>, %arg5: memref<64x128xf32, #tpu.memory_space<vmem>>, %arg6: memref<16x1xf32, #tpu.memory_space<vmem>>, %arg7: memref<64x128xbf16, #tpu.memory_space<vmem>>, %arg8: memref<64x128xbf16, #tpu.memory_space<vmem>>) attributes {dimension_semantics = [#tpu.dimension_semantics<parallel>, #tpu.dimension_semantics<arbitrary>], iteration_bounds = array<i64: 2, 2>, scalar_prefetch = 0 : i64, scratch_operands = 2 : i64, tpu.core_type = #tpu.core_type<tc>, window_params = [{transform_indices = @transform_0, window_bounds = array<i64: 16, 128>}, {transform_indices = @transform_1, window_bounds = array<i64: 16, 128>}, {pipeline_mode = #tpu.pipeline_mode<synchronous>, transform_indices = @transform_2, window_bounds = array<i64: 64, 128>}, {pipeline_mode = #tpu.pipeline_mode<synchronous>, transform_indices = @transform_3, window_bounds = array<i64: 64, 128>}, {transform_indices = @transform_4, window_bounds = array<i64: 16, 1>}]} {
    %c0_i32 = arith.constant 0 : i32
    %0 = arith.cmpi eq, %arg1, %c0_i32 : i32
    %1 = arith.extui %0 : i1 to i32
    %c0_i32_0 = arith.constant 0 : i32
    %2 = arith.cmpi ne, %1, %c0_i32_0 : i32
    scf.if %2 {
      %c0_i32_23 = arith.constant 0 : i32
      %c4_i32 = arith.constant 4 : i32
      %61 = arith.addi %c0_i32_23, %c4_i32 : i32
      %c1_i32 = arith.constant 1 : i32
      scf.for %arg9 = %c0_i32_23 to %61 step %c1_i32  : i32 {
        %c16_i32_25 = arith.constant 16 : i32
        %62 = arith.muli %arg9, %c16_i32_25 : i32
        %63 = tpu.assume_multiple %62, 16 : i32
        %64 = arith.index_cast %63 : i32 to index
        %c0_26 = arith.constant 0 : index
        %65 = vector.load %arg4[%64, %c0_26] : memref<64x128xf32, #tpu.memory_space<vmem>>, vector<16x128xf32>
        %66 = arith.mulf %65, %65 : vector<16x128xf32>
        %cst_27 = arith.constant dense<0.000000e+00> : vector<16xf32>
        %67 = vector.multi_reduction <add>, %66, %cst_27 [1] : vector<16x128xf32> to vector<16xf32>
        %68 = vector.shape_cast %67 : vector<16xf32> to vector<16x1xf32>
        %cst_28 = arith.constant 1.000000e-24 : f32
        %69 = vector.broadcast %cst_28 : f32 to vector<16x1xf32>
        %70 = arith.maximumf %68, %69 : vector<16x1xf32>
        %71 = math.rsqrt %70 : vector<16x1xf32>
        %72 = vector.broadcast %71 : vector<16x1xf32> to vector<16x128xf32>
        %73 = arith.mulf %65, %72 : vector<16x128xf32>
        %74 = arith.truncf %73 : vector<16x128xf32> to vector<16x128xbf16>
        %75 = arith.index_cast %63 : i32 to index
        %c0_29 = arith.constant 0 : index
        %76 = vector.load %arg7[%75, %c0_29] : memref<64x128xbf16, #tpu.memory_space<vmem>>, vector<16x128xbf16>
        tpu.vector_store %arg7[%75, %c0_29], %74 {strides = array<i32>} : memref<64x128xbf16, #tpu.memory_space<vmem>>, vector<16x128xbf16>,
        %77 = arith.index_cast %63 : i32 to index
        %c0_30 = arith.constant 0 : index
        %78 = vector.load %arg5[%77, %c0_30] : memref<64x128xf32, #tpu.memory_space<vmem>>, vector<16x128xf32>
        %79 = arith.mulf %78, %78 : vector<16x128xf32>
        %cst_31 = arith.constant dense<0.000000e+00> : vector<16xf32>
        %80 = vector.multi_reduction <add>, %79, %cst_31 [1] : vector<16x128xf32> to vector<16xf32>
        %81 = vector.shape_cast %80 : vector<16xf32> to vector<16x1xf32>
        %cst_32 = arith.constant 1.000000e-24 : f32
        %82 = vector.broadcast %cst_32 : f32 to vector<16x1xf32>
        %83 = arith.maximumf %81, %82 : vector<16x1xf32>
        %84 = math.rsqrt %83 : vector<16x1xf32>
        %85 = vector.broadcast %84 : vector<16x1xf32> to vector<16x128xf32>
        %86 = arith.mulf %78, %85 : vector<16x128xf32>
        %87 = arith.truncf %86 : vector<16x128xf32> to vector<16x128xbf16>
        %88 = arith.index_cast %63 : i32 to index
        %c0_33 = arith.constant 0 : index
        %89 = vector.load %arg8[%88, %c0_33] : memref<64x128xbf16, #tpu.memory_space<vmem>>, vector<16x128xbf16>
        tpu.vector_store %arg8[%88, %c0_33], %87 {strides = array<i32>} : memref<64x128xbf16, #tpu.memory_space<vmem>>, vector<16x128xbf16>,
      }
      %c4_i32_24 = arith.constant 4 : i32
    } else {
    }
    %c2_i32 = arith.constant 2 : i32
    %3 = arith.muli %arg0, %c2_i32 : i32
    %4 = arith.addi %3, %arg1 : i32
    %c16_i32 = arith.constant 16 : i32
    %5 = arith.muli %4, %c16_i32 : i32
    %6 = tpu.assume_multiple %5, 16 : i32
    %c0 = arith.constant 0 : index
    %c0_1 = arith.constant 0 : index
    %7 = vector.load %arg2[%c0, %c0_1] : memref<16x128xf32, #tpu.memory_space<vmem>>, vector<16x128xf32>
    %8 = arith.mulf %7, %7 : vector<16x128xf32>
    %cst = arith.constant dense<0.000000e+00> : vector<16xf32>
    %9 = vector.multi_reduction <add>, %8, %cst [1] : vector<16x128xf32> to vector<16xf32>
    %10 = vector.shape_cast %9 : vector<16xf32> to vector<16x1xf32>
    %cst_2 = arith.constant 1.000000e-24 : f32
    %11 = vector.broadcast %cst_2 : f32 to vector<16x1xf32>
    %12 = arith.maximumf %10, %11 : vector<16x1xf32>
    %13 = math.rsqrt %12 : vector<16x1xf32>
    %cst_3 = arith.constant 14.2857141 : f32
    %14 = vector.broadcast %cst_3 : f32 to vector<16x1xf32>
    %15 = arith.mulf %13, %14 : vector<16x1xf32>
    %16 = vector.broadcast %15 : vector<16x1xf32> to vector<16x128xf32>
    %17 = arith.mulf %7, %16 : vector<16x128xf32>
    %18 = arith.truncf %17 : vector<16x128xf32> to vector<16x128xbf16>
    %c0_4 = arith.constant 0 : index
    %c0_5 = arith.constant 0 : index
    %19 = vector.load %arg7[%c0_4, %c0_5] : memref<64x128xbf16, #tpu.memory_space<vmem>>, vector<64x128xbf16>
    %cst_6 = arith.constant dense<0.000000e+00> : vector<16x64xf32>
    %20 = tpu.matmul %18, %19, %cst_6 {dimension_numbers = #tpu.dot_dimension_numbers<[1], [1], [0], [0], [0, 0, 1, 0], [], []>} : vector<16x128xbf16>, vector<64x128xbf16>, vector<16x64xf32> -> vector<16x64xf32>
    %21 = arith.index_cast %6 : i32 to index
    %c0_7 = arith.constant 0 : index
    %22 = vector.load %arg7[%21, %c0_7] : memref<64x128xbf16, #tpu.memory_space<vmem>>, vector<16x128xbf16>
    %23 = arith.extf %22 : vector<16x128xbf16> to vector<16x128xf32>
    %24 = arith.extf %18 : vector<16x128xbf16> to vector<16x128xf32>
    %25 = arith.mulf %24, %23 : vector<16x128xf32>
    %cst_8 = arith.constant dense<0.000000e+00> : vector<16xf32>
    %26 = vector.multi_reduction <add>, %25, %cst_8 [1] : vector<16x128xf32> to vector<16xf32>
    %27 = vector.shape_cast %26 : vector<16xf32> to vector<16x1xf32>
    %28 = math.exp %20 : vector<16x64xf32>
    %cst_9 = arith.constant dense<0.000000e+00> : vector<16xf32>
    %29 = vector.multi_reduction <add>, %28, %cst_9 [1] : vector<16x64xf32> to vector<16xf32>
    %30 = vector.shape_cast %29 : vector<16xf32> to vector<16x1xf32>
    %31 = math.log %30 : vector<16x1xf32>
    %32 = arith.subf %31, %27 : vector<16x1xf32>
    %c0_10 = arith.constant 0 : index
    %c0_11 = arith.constant 0 : index
    %33 = vector.load %arg3[%c0_10, %c0_11] : memref<16x128xf32, #tpu.memory_space<vmem>>, vector<16x128xf32>
    %34 = arith.mulf %33, %33 : vector<16x128xf32>
    %cst_12 = arith.constant dense<0.000000e+00> : vector<16xf32>
    %35 = vector.multi_reduction <add>, %34, %cst_12 [1] : vector<16x128xf32> to vector<16xf32>
    %36 = vector.shape_cast %35 : vector<16xf32> to vector<16x1xf32>
    %cst_13 = arith.constant 1.000000e-24 : f32
    %37 = vector.broadcast %cst_13 : f32 to vector<16x1xf32>
    %38 = arith.maximumf %36, %37 : vector<16x1xf32>
    %39 = math.rsqrt %38 : vector<16x1xf32>
    %cst_14 = arith.constant 14.2857141 : f32
    %40 = vector.broadcast %cst_14 : f32 to vector<16x1xf32>
    %41 = arith.mulf %39, %40 : vector<16x1xf32>
    %42 = vector.broadcast %41 : vector<16x1xf32> to vector<16x128xf32>
    %43 = arith.mulf %33, %42 : vector<16x128xf32>
    %44 = arith.truncf %43 : vector<16x128xf32> to vector<16x128xbf16>
    %c0_15 = arith.constant 0 : index
    %c0_16 = arith.constant 0 : index
    %45 = vector.load %arg8[%c0_15, %c0_16] : memref<64x128xbf16, #tpu.memory_space<vmem>>, vector<64x128xbf16>
    %cst_17 = arith.constant dense<0.000000e+00> : vector<16x64xf32>
    %46 = tpu.matmul %44, %45, %cst_17 {dimension_numbers = #tpu.dot_dimension_numbers<[1], [1], [0], [0], [0, 0, 1, 0], [], []>} : vector<16x128xbf16>, vector<64x128xbf16>, vector<16x64xf32> -> vector<16x64xf32>
    %47 = arith.index_cast %6 : i32 to index
    %c0_18 = arith.constant 0 : index
    %48 = vector.load %arg8[%47, %c0_18] : memref<64x128xbf16, #tpu.memory_space<vmem>>, vector<16x128xbf16>
    %49 = arith.extf %48 : vector<16x128xbf16> to vector<16x128xf32>
    %50 = arith.extf %44 : vector<16x128xbf16> to vector<16x128xf32>
    %51 = arith.mulf %50, %49 : vector<16x128xf32>
    %cst_19 = arith.constant dense<0.000000e+00> : vector<16xf32>
    %52 = vector.multi_reduction <add>, %51, %cst_19 [1] : vector<16x128xf32> to vector<16xf32>
    %53 = vector.shape_cast %52 : vector<16xf32> to vector<16x1xf32>
    %54 = math.exp %46 : vector<16x64xf32>
    %cst_20 = arith.constant dense<0.000000e+00> : vector<16xf32>
    %55 = vector.multi_reduction <add>, %54, %cst_20 [1] : vector<16x64xf32> to vector<16xf32>
    %56 = vector.shape_cast %55 : vector<16xf32> to vector<16x1xf32>
    %57 = math.log %56 : vector<16x1xf32>
    %58 = arith.subf %57, %53 : vector<16x1xf32>
    %59 = arith.addf %32, %58 : vector<16x1xf32>
    %c0_21 = arith.constant 0 : index
    %c0_22 = arith.constant 0 : index
    %60 = vector.load %arg6[%c0_21, %c0_22] : memref<16x1xf32, #tpu.memory_space<vmem>>, vector<16x1xf32>
    tpu.vector_store %arg6[%c0_21, %c0_22], %59 {strides = array<i32>} : memref<16x1xf32, #tpu.memory_space<vmem>>, vector<16x1xf32>,
    return
  }
  func.func @transform_0(%arg0: i32, %arg1: i32) -> (i32, i32) {
    %c2_i32 = arith.constant 2 : i32
    %0 = arith.muli %arg0, %c2_i32 : i32
    %1 = arith.addi %0, %arg1 : i32
    %c0_i32 = arith.constant 0 : i32
    %c0_i32_0 = arith.constant 0 : i32
    return %1, %c0_i32 : i32, i32
  }
  func.func @transform_1(%arg0: i32, %arg1: i32) -> (i32, i32) {
    %c2_i32 = arith.constant 2 : i32
    %0 = arith.muli %arg0, %c2_i32 : i32
    %1 = arith.addi %0, %arg1 : i32
    %c0_i32 = arith.constant 0 : i32
    %c0_i32_0 = arith.constant 0 : i32
    return %1, %c0_i32 : i32, i32
  }
  func.func @transform_2(%arg0: i32, %arg1: i32) -> (i32, i32) {
    %c0_i32 = arith.constant 0 : i32
    %c0_i32_0 = arith.constant 0 : i32
    %c0_i32_1 = arith.constant 0 : i32
    return %c0_i32, %c0_i32_0 : i32, i32
  }
  func.func @transform_3(%arg0: i32, %arg1: i32) -> (i32, i32) {
    %c0_i32 = arith.constant 0 : i32
    %c0_i32_0 = arith.constant 0 : i32
    %c0_i32_1 = arith.constant 0 : i32
    return %c0_i32, %c0_i32_0 : i32, i32
  }
  func.func @transform_4(%arg0: i32, %arg1: i32) -> (i32, i32) {
    %c2_i32 = arith.constant 2 : i32
    %0 = arith.muli %arg0, %c2_i32 : i32
    %1 = arith.addi %0, %arg1 : i32
    %c0_i32 = arith.constant 0 : i32
    %c0_i32_0 = arith.constant 0 : i32
    return %1, %c0_i32 : i32, i32
  }
}

</mosaic_0001>

<bundles_post_ra>
// kernel: tpu_custom_call.1
= control target key start
LH: loop header
LB: loop body
LE: loop exit
PB: predicated region body
PF: predicated region fallthrough
CT: control target
= control target key end

     0   :  { %s1529_s0 = inlined_call_operand.hbm [shape: f32[64,128], index: 0, kind: input, shape index: {}]   ;;  %s1530_s1 = inlined_call_operand.hbm [shape: f32[64,128], index: 1, kind: input, shape index: {}]   ;;  %s1531_s2 = inlined_call_operand.hbm [shape: f32[64,128], index: 2, kind: input, shape index: {}]   ;;  %s1532_s3 = inlined_call_operand.hbm [shape: f32[64,128], index: 3, kind: input, shape index: {}]   ;;  %s1533_s4 = inlined_call_operand.vmem [shape: f32[64,1], index: 4, kind: output, shape index: {}]  }
   0x1   :  { %1542 = sst [smem:[#allocation18_spill]] %s1529_s0 }
   0x2   :  { %1543 = sst [smem:[#allocation19_spill]] %s1531_s2 }
   0x3   :  { %1544 = sst [smem:[#allocation20_spill]] %s1532_s3 }
   0x4   :  { %9 = vsyncpa [#allocation5], 0 }
   0x5   :  { %11 = vsyncpa [#allocation5 + $0x1], 0 }
   0x6   :  { %12 = vsyncpa [#allocation7], 0 }
   0x7   :  { %14 = vsyncpa [#allocation7 + $0x1], 0 }
   0x8   :  { %15 = vsyncpa [#allocation10], 0  ;;  %s1281_s15 = smov 0   ;;  %s1283_s16 = smov 0  }
   0x9   :  { %s1285_s17 = smov 0   ;;  %s1287_s18 = smov 0  }
   0xa   :  { %s1289_s19 = smov 0   ;;  %s1291_s20 = smov 0  }
   0xb   :  { %s1293_s21 = smov 0   ;;  %s1295_s22 = smov 0  }
   0xc LB: > { %1545 = sst [smem:[#allocation15_spill]] %s1238_s21  ;;  %s1534_s23 = sadd.s32 4294967295, %s1242_s22   ;;  %s1242_s22 = sphi %s1295_s22, %s21_s22   ;;  %s1238_s21 = sphi %s1293_s21, %s1562_s21   ;;  %s1234_s20 = sphi %s1291_s20, %s1567_s20   ;;  %s1230_s19 = sphi %s1289_s19, %s1560_s19   ;;  %s1226_s18 = sphi %s1287_s18, %s1566_s18   ;;  %s1222_s17 = sphi %s1285_s17, %s1565_s17   ;;  %s1218_s16 = sphi %s1283_s16, %s1564_s16   ;;  %s1214_s15 = sphi %s1281_s15, %s1563_s15  }
   0xd   : > { %p57_p0 = scmp.ne.s32.totalorder %s1218_s16, %s1214_s15  ;;  %p1323_p1 = scmp.eq.s32.totalorder %s1534_s23, 0 }
   0xe   : > { %p803_p2 = scmp.ge.s32.totalorder %s1242_s22, 1  ;;  %p170_p3 = scmp.lt.s32.totalorder %s1242_s22, 5 }
   0xf   : > { %p1331_p4 = por %p1323_p1, %p57_p0  ;;  %s1248_s27 = smov [#allocation8]  }
  0x10   : > { %p1335_p5 = pnand %p803_p2, %p170_p3  ;;  %s182_s28 = sshll.u32 %s1248_s27, 4  ;;  %s183_s28 = int_to_ptr.vmem [resolvable:$true] %s182_s28 }
  0x11   : > { %s1249_s30 = smov [#allocation9]   ;;  %s1063_s6 = scalar_lea.vmem %s183_s28, 1024 }
  0x12   : > { %p915_p6 = pneg %p1335_p5  ;;  %s195_s5 = sshll.u32 %s1249_s30, 4  ;;  %s196_s5 = int_to_ptr.vmem [resolvable:$true] %s195_s5 }
  0x13   : > { %p1064_p9 = scmp.ne.s32.totalorder %s183_s28, %s1063_s6  ;;  %p1071_p12 = scmp.lt.s32.totalorder %s183_s28, %s183_s28 }
  0x14   : > { %p1343_p7 = pnand %p915_p6, %p1323_p1  ;;  %p1072_p13 = scmp.lt.s32.totalorder %s1063_s6, %s1063_s6 }
  0x16   : > { %p1054_p8 = pneg %p1343_p7  ;;  %p1073_p0 = por %p1072_p13, %p1071_p12 }
  0x18   : > { %p1066_p10 = pnand %p1064_p9, %p1054_p8 }
  0x1a   : > { %p1067_p11 = pneg %p1066_p10 }
  0x1c   : > { %p1074_p2 = pnand %p1073_p0, %p1067_p11 }
  0x1e   : > { %1077 = shalt.err (!%p1074_p2)
}
  0x1f   : > { %s1535_s7 = smov 128   ;;  %s1537_s8 = smov 8  }
  0x20   : > { %s1550_s2 = sld [smem:[#allocation19_spill]]  ;;  %s1089_s11 = scalar_lea.vmem %s196_s5, 1024 }
  0x21   : > { %p1090_p3 = scmp.ne.s32.totalorder %s196_s5, %s1089_s11  ;;  %p1097_p10 = scmp.lt.s32.totalorder %s196_s5, %s196_s5 }
  0x22   : > { %p1098_p11 = scmp.lt.s32.totalorder %s1089_s11, %s1089_s11 }
  0x23   : > { %p1092_p6 = pnand %p1090_p3, %p1054_p8 }
  0x24   : > { %p1099_p12 = por %p1098_p11, %p1097_p10 }
  0x25   : > { %p1093_p9 = pneg %p1092_p6 }
  0x26   : > { %918 = dma.hbm_to_vmem [thread:$0]  (!%p1343_p7), %s1550_s2, 1024, %s183_s28, [#allocation7], %s1535_s7, %s1535_s7, %s1537_s8  }
  0x27   : > { %p1100_p13 = pnand %p1099_p12, %p1093_p9 }
  0x29   : > { %1103 = shalt.err (!%p1100_p13)
}
  0x2a   : > { %s1551_s3 = sld [smem:[#allocation20_spill]]  ;;  %s30_s14 = sadd.s32 1, %s1234_s20 }
  0x2b   : > { %s33_s15 = sadd.s32 1, %s1238_s21  ;;  %p31_p8 = scmp.ge.s32.totalorder %s30_s14, 2 }
  0x2c   : > { %s797_s27 = sshll.u32 %s1238_s21, 1  ;;  %s44_s29 = sadd.s32 1, %s1222_s17 }
  0x2d   : > { %s1375_s28 = sadd.s32 %s1234_s20, %s797_s27  ;;  %s1569_s14 = smov (%p31_p8, %s30_s14), 0 }
  0x2e   : > { %1552 = sst [smem:[#allocation16_spill]] %s1569_s14  ;;  %s1571_s15 = smov (!%p31_p8, %s33_s15), %s1238_s21 }
  0x2f   : > { %p51_p0 = scmp.ne.s32.totalorder %s1222_s17, %s1218_s16  ;;  %p52_p2 = scmp.eq.s32.totalorder %s1242_s22, 0 }
  0x30   : > { %921 = dma.hbm_to_vmem [thread:$0]  (!%p1343_p7), %s1551_s3, 1024, %s196_s5, [#allocation10], %s1535_s7, %s1535_s7, %s1537_s8  }
  0x31   : > { %p35_p3 = scmp.ge.s32.totalorder %s1571_s15, 2  ;;  %p931_p7 = scmp.lt.s32.totalorder %s1242_s22, 4 }
  0x32   : > { %p1385_p6 = por %p52_p2, %p51_p0  ;;  %s209_s5 = sand.u32 1, %s1222_s17  }
  0x33   : > { %s1573_s15 = smov (%p35_p3, %s1571_s15), 0  ;;  %s1392_s6 = sshll.u32 %s209_s5, 4 }
  0x34   : > { %1554 = sst [smem:[#allocation17_spill]] %s1573_s15  ;;  %s798_s9 = sshll.u32 %s1573_s15, 1 }
  0x35   : > { %s40_s10 = sadd.s32 %s798_s9, %s1569_s14  ;;  %s845_s11 = sshll.u32 %s1375_s28, 8 }
  0x36   : > { %s41_s12 = ssub.s32 %s1375_s28, %s40_s10  ;;  %s1555_s0 = sld [smem:[#allocation18_spill]] }
  0x37   : > { %p42_p9 = scmp.eq.s32.totalorder %s41_s12, 0  ;;  %s213_s7 = scalar_lea.vmem [#allocation4], %s1392_s6 }
  0x38   : > { %s222_s8 = sshll.u32 %s213_s7, 4  ;;  %p1408_p10 = pnand %p931_p7, %p1385_p6  ;;  %s223_s8 = int_to_ptr.vmem [resolvable:$true] %s222_s8 }
  0x39   : > { %s1413_s9 = scalar_select %p42_p9, %s1222_s17, %s44_s29  }
  0x3a   : > { %s210_s10 = scalar_lea.sflag [#allocation5], %s209_s5  ;;  %p1106_p11 = pneg %p1408_p10 }
  0x3b   : > { %s1117_s3 = scalar_lea.vmem %s223_s8, 256  ;;  %s1252_s7 = smov [#allocation4]  }
  0x3c   : > { %s221_s23 = scalar_lea.hbm %s1555_s0, %s845_s11  ;;  %p1118_p12 = scmp.ne.s32.totalorder %s223_s8, %s1117_s3 }
  0x3d   : > { %s1122_s30 = sshll.u32 %s1252_s7, 4  ;;  %s1123_s30 = int_to_ptr.vmem [resolvable:$false] %s1122_s30 }
  0x3e   : > { %p1120_p13 = pnand %p1118_p12, %p1106_p11  ;;  %s1124_s12 = scalar_lea.vmem %s1123_s30, 512 }
  0x3f   : > { %p1125_p0 = scmp.lt.s32.totalorder %s223_s8, %s1123_s30  ;;  %p1126_p2 = scmp.lt.s32.totalorder %s1124_s12, %s1117_s3 }
  0x40   : > { %p1121_p8 = pneg %p1120_p13 }
  0x41   : > { %p1127_p3 = por %p1126_p2, %p1125_p0 }
  0x43   : > { %p1128_p7 = pnand %p1127_p3, %p1121_p8 }
  0x45   : > { %1131 = shalt.err (!%p1128_p7)
}
  0x46   : > { %s1557_s29 = smov 8   ;;  %s1558_s5 = smov 128  }
  0x47   : > { %925 = dma.hbm_to_vmem [thread:$0]  (!%p1408_p10), %s221_s23, 256, %s223_s8, %s210_s10, %s1558_s5, %s1558_s5, %s1557_s29  }
  0x48   : > { %s244_s7 = scalar_lea.hbm %s1530_s1, %s845_s11  ;;  %s236_s30 = scalar_lea.vmem [#allocation6], %s1392_s6 }
  0x49   : > { %s245_s3 = sshll.u32 %s236_s30, 4  ;;  %s232_s12 = sand.u32 1, %s1242_s22   ;;  %s246_s3 = int_to_ptr.vmem [resolvable:$true] %s245_s3 }
  0x4a   : > { %s233_s0 = scalar_lea.sflag [#allocation7], %s232_s12  ;;  %s1145_s15 = scalar_lea.vmem %s246_s3, 256 }
  0x4b   : > { %p1146_p6 = scmp.ne.s32.totalorder %s246_s3, %s1145_s15  ;;  %s1253_s14 = smov [#allocation6]  }
  0x4c   : > { %s1150_s21 = sshll.u32 %s1253_s14, 4  ;;  %s1151_s21 = int_to_ptr.vmem [resolvable:$false] %s1150_s21 }
  0x4d   : > { %p1148_p9 = pnand %p1146_p6, %p1106_p11  ;;  %s1152_s23 = scalar_lea.vmem %s1151_s21, 512 }
  0x4e   : > { %p1153_p13 = scmp.lt.s32.totalorder %s246_s3, %s1151_s21  ;;  %p1154_p8 = scmp.lt.s32.totalorder %s1152_s23, %s1145_s15 }
  0x4f   : > { %p1149_p12 = pneg %p1148_p9 }
  0x50   : > { %p1155_p0 = por %p1154_p8, %p1153_p13 }
  0x52   : > { %p1156_p2 = pnand %p1155_p0, %p1149_p12 }
  0x54   : > { %1159 = shalt.err (!%p1156_p2)
}
  0x55   : > { %928 = dma.hbm_to_vmem [thread:$0]  (!%p1408_p10), %s244_s7, 256, %s246_s3, %s233_s0, %s1558_s5, %s1558_s5, %s1557_s29  }
  0x56   : > { %257 = sbr.rel (%p1335_p5) target bundleno = 819 (0x333), region = 36  ;;  %s259_s8 = sand.u32 (!%p1335_p5), 1, %s1218_s16  }
  0x57   : > { %s1443_s14 = sshll.u32 (!%p1335_p5), %s259_s8, 4  ;;  %s260_s21 = scalar_lea.sflag (!%p1335_p5), [#allocation5], %s259_s8 }
  0x58   : > { %s263_s15 = scalar_lea.vmem (!%p1335_p5), [#allocation4], %s1443_s14 }
  0x5b   : > { %1197 = dma.done.wait (%p1331_p4), %s260_s21, 256  }
  0x5c   : > { %1199 = vsyncadd (%p1331_p4), %s260_s21, 4294967040  ;;  %s1559_s2 = sadd.s32 4294967295, %s1242_s22   ;;  %s272_s28 = scalar_lea.vmem [#allocation6], %s1443_s14 }
  0x5d   : > { %s268_s0 = sand.u32 1, %s1559_s2  }
  0x5e   : > { %s269_s26 = scalar_lea.sflag [#allocation7], %s268_s0 }
  0x5f   : > { %1201 = dma.done.wait (%p1331_p4), %s269_s26, 256  }
  0x60   : > { %1203 = vsyncadd (%p1331_p4), %s269_s26, 4294967040 }
  0x61   : > { %1205 = dma.done.wait (%p1323_p1), [#allocation7], 1024  }
  0x62   : > { %1207 = vsyncadd (%p1323_p1), [#allocation7], 4294966272 }
  0x63   : > { %1209 = dma.done.wait (%p1323_p1), [#allocation10], 1024  }
  0x64   : > { %1211 = vsyncadd (%p1323_p1), [#allocation10], 4294966272  ;;  %s820_s6 = sshll.u32 %s1230_s19, 1  ;;  %p823_p5 = scmp.ne.s32.totalorder %s1226_s18, 0 }
  0x65   : > { %s1467_s11 = sadd.s32 %s1226_s18, %s820_s6  ;;  %s1476_s24 = smov (!%p823_p5), 0  }
  0x66   : > { %s821_s25 = sshll.u32 %s1467_s11, 1 }
  0x67   : > { %p321_p4 = scmp.lt.s32.totalorder %s821_s25, 7  ;;  %332 = sbr.rel (%p823_p5) target bundleno = 277 (0x115), region = 56 }
  0x69   : > { %s1575_s25 = smov (!%p321_p4, %s821_s25), 7 }
  0x6a   : > { %s822_s10 = sshll.u32 %s1575_s25, 3 }
  0x6b   : > { %s1473_s13 = scalar_lea.vmem %s1533_s4, %s822_s10 }
  0x6c LB: >> { %s1482_s19 = sshll.u32 %s1246_s24, 4  ;;  %s338_s24 = sadd.s32 1, %s1246_s24   ;;  %s1246_s24 = sphi %s1476_s24, %s338_s24  }
  0x6d   : >> { %s369_s27 = scalar_lea.vmem [#allocation9], %s1482_s19  ;;  %s340_s7 = scalar_lea.vmem [#allocation8], %s1482_s19 }
  0x6e   : >> { %v370_v0 = vld [vmem:[%s369_s27] sm:$0xff]  ;;  %v371_v1 = vld [vmem:[%s369_s27 + $0x8] sm:$0xff]  ;;  %s363_s18 = sshra.s32 %s1482_s19, 3  ;;  %p335_p1 = scmp.ge.s32.totalorder %s338_s24, 4  }
  0x6f   : >> { %v372_v2 = vmul.f32 %v370_v0, %v370_v0  ;;  %v341_v3 = vld [vmem:[%s340_s7] sm:$0xff]  ;;  %v342_v4 = vld [vmem:[%s340_s7 + $0x8] sm:$0xff]  ;;  %v373_v6 = vmul.f32 %v371_v1, %v371_v1  ;;  %s827_s30 = sshll.u32 %s363_s18, 2 }
  0x70   : >> { %v343_v5 = vmul.f32 %v341_v3, %v341_v3  ;;  %v344_v7 = vmul.f32 %v342_v4, %v342_v4  ;;  %s393_s3 = scalar_lea.vmem [#allocation3], %s827_s30  ;;  %s366_s12 = scalar_lea.vmem [#allocation2], %s827_s30 }
  0x71   : >> { %374 = vadd.xlane.f32.xlu1 %v372_v2 }
  0x72   : >> { %345 = vadd.xlane.f32.xlu0 %v343_v5 }
  0x75   : >> { %376 = vadd.xlane.f32.xlu1 %v373_v6 }
  0x76   : >> { %347 = vadd.xlane.f32.xlu0 %v344_v7 }
  0xfa   : >> { %v375_v8 = vpop.xlane.xlu1 %374 }
  0xfb   : >> { %v378_v9 = vmax.f32 %v375_v8, 1e-24  ;;  %v346_v10 = vpop.xlane.xlu0 %345 }
  0xfc   : >> { %v349_v11 = vmax.f32 %v346_v10, 1e-24 }
  0xfd   : >> { %1012 = vrsqrt.f32 %v378_v9 }
  0xfe   : >> { %v377_v12 = vpop.xlane.xlu1 %376  ;;  %1014 = vrsqrt.f32 %v349_v11 }
  0xff   : >> { %v379_v13 = vmax.f32 %v377_v12, 1e-24  ;;  %v348_v14 = vpop.xlane.xlu0 %347 }
 0x100   : >> { %v350_v15 = vmax.f32 %v348_v14, 1e-24 }
 0x101   : >> { %1016 = vrsqrt.f32 %v379_v13 }
 0x102   : >> { %1018 = vrsqrt.f32 %v350_v15 }
 0x10a   : >> { %v1013_v16 = vpop.eup %1012 }
 0x10b   : >> { %v1015_v17 = vpop.eup %1014  ;;  %v382_v20 = vmul.f32 %v1013_v16, %v370_v0 }
 0x10c   : >> { %v353_v22 = vmul.f32 %v1015_v17, %v341_v3 }
 0x10e   : >> { %v1017_v18 = vpop.eup %1016 }
 0x10f   : >> { %v1019_v19 = vpop.eup %1018  ;;  %v383_v21 = vmul.f32 %v1017_v18, %v371_v1 }
 0x110   : >> { %v354_v23 = vmul.f32 %v1019_v19, %v342_v4  ;;  %337 = sbr.rel (!%p335_p1) target bundleno = 108 (0x6c), region = 114 }
 0x111   : >> { %v859_v24 = vpack.c.bf16 %v383_v21, %v382_v20 }
 0x112   : >> { %v854_v25 = vpack.c.bf16 %v354_v23, %v353_v22 }
 0x113   : >> { %860 = vst [vmem:[%s393_s3] sm:$0xff] %v859_v24  }
 0x114   : >> { %855 = vst [vmem:[%s366_s12] sm:$0xff] %v854_v25  }
 0x115 PF: > { %v522_v26 = vld [vmem:[%s272_s28] sm:$0xff]  ;;  %v523_v28 = vld [vmem:[%s272_s28 + $0x8] sm:$0xff]  ;;  %v1254_v32 = vmov 0.0   ;;  %vm1255_vm0 = vmmov 0   ;;  %s832_s23 = sshll.u32 %s1467_s11, 4  ;;  %vm509_vm1 = vcmask 523264  }
 0x116   : > { %v399_v27 = vld [vmem:[%s263_s15] sm:$0xff]  ;;  %v524_v29 = vmul.f32 %v522_v26, %v522_v26  ;;  %v400_v31 = vld [vmem:[%s263_s15 + $0x8] sm:$0xff]  ;;  %879 = vmatprep.subr.bf16.mxu0 %v1254_v32  ;;  %891 = vmatprep.subr.bf16.mxu1 %v1254_v32  ;;  %v525_v34 = vmul.f32 %v523_v28, %v523_v28  ;;  %s489_s8 = sshra.s32 %s832_s23, 3  ;;  %vm644_vm2 = vcmask 7168  }
 0x117   : > { %v401_v30 = vmul.f32 %v399_v27, %v399_v27  ;;  %v402_v35 = vmul.f32 %v400_v31, %v400_v31  ;;  %887 = vmatprep.mubr.msk.bf16.mxu0 %vm1255_vm0, %v1254_v32  ;;  %899 = vmatprep.mubr.msk.bf16.mxu1 %vm1255_vm0, %v1254_v32  ;;  %s837_s14 = sshll.u32 %s489_s8, 2 }
 0x118   : > { %526 = vadd.xlane.f32.xlu1 %v524_v29  ;;  %s613_s21 = scalar_lea.vmem [#allocation3], %s837_s14  ;;  %s492_s15 = scalar_lea.vmem [#allocation2], %s837_s14 }
 0x119   : > { %403 = vadd.xlane.f32.xlu0 %v401_v30 }
 0x11a   : > { %v1021_v36 = vld [vmem:[#allocation3 + $0x18] sm:$0xff]   ;;  %v1023_v38 = vld [vmem:[#allocation3 + $0x10] sm:$0xff]   ;;  %v1025_v40 = vld [vmem:[#allocation3 + $0x8] sm:$0xff]  }
 0x11b   : > { %v1020_v33 = vld [vmem:[#allocation2 + $0x18] sm:$0xff]   ;;  %892 = vmatpush3.bf16.xpose.msra.mxu1 %v1021_v36  ;;  %v1022_v37 = vld [vmem:[#allocation2 + $0x10] sm:$0xff]   ;;  %v1024_v39 = vld [vmem:[#allocation2 + $0x8] sm:$0xff]  }
 0x11c   : > { %880 = vmatpush3.bf16.xpose.msra.mxu0 %v1020_v33  ;;  %893 = vmatprep.subr.bf16.mxu1 %v1254_v32  ;;  %v1026_v41 = vld [vmem:[#allocation2] sm:$0xff]  }
 0x11d   : > { %881 = vmatprep.subr.bf16.mxu0 %v1254_v32  ;;  %528 = vadd.xlane.f32.xlu1 %v525_v34  ;;  %v1027_v42 = vld [vmem:[#allocation3] sm:$0xff]  }
 0x11e   : > { %405 = vadd.xlane.f32.xlu0 %v402_v35  ;;  %v866_v16 = vld [vmem:[%s613_s21] sm:$0xff]  }
 0x11f   : > { %v862_v18 = vld [vmem:[%s492_s15] sm:$0xff]   ;;  %v867_v20 = vunpack.c.l.bf16 %v866_v16 }
 0x120   : > { %v863_v24 = vunpack.c.l.bf16 %v862_v18 }
 0x123   : > { %894 = vmatpush3.bf16.xpose.msra.mxu1 %v1023_v38 }
 0x124   : > { %882 = vmatpush3.bf16.xpose.msra.mxu0 %v1022_v37  ;;  %895 = vmatprep.subr.bf16.mxu1 %v1254_v32 }
 0x125   : > { %883 = vmatprep.subr.bf16.mxu0 %v1254_v32 }
 0x12b   : > { %896 = vmatpush3.bf16.xpose.msra.mxu1 %v1025_v40 }
 0x12c   : > { %884 = vmatpush3.bf16.xpose.msra.mxu0 %v1024_v39  ;;  %897 = vmatprep.subr.bf16.mxu1 %v1254_v32 }
 0x12d   : > { %885 = vmatprep.subr.bf16.mxu0 %v1254_v32 }
 0x133   : > { %898 = vmatpush3.bf16.xpose.msra.mxu1 %v1027_v42 }
 0x134   : > { %886 = vmatpush3.bf16.xpose.msra.mxu0 %v1026_v41 }
 0x1a1   : > { %v527_v43 = vpop.xlane.xlu1 %526 }
 0x1a2   : > { %v404_v44 = vpop.xlane.xlu0 %403  ;;  %v530_v45 = vmax.f32 %v527_v43, 1e-24 }
 0x1a3   : > { %v407_v46 = vmax.f32 %v404_v44, 1e-24 }
 0x1a4   : > { %1028 = vrsqrt.f32 %v530_v45 }
 0x1a5   : > { %1030 = vrsqrt.f32 %v407_v46 }
 0x1a6   : > { %v529_v47 = vpop.xlane.xlu1 %528 }
 0x1a7   : > { %v406_v48 = vpop.xlane.xlu0 %405  ;;  %v531_v49 = vmax.f32 %v529_v47, 1e-24 }
 0x1a8   : > { %v408_v50 = vmax.f32 %v406_v48, 1e-24 }
 0x1a9   : > { %1032 = vrsqrt.f32 %v531_v49 }
 0x1aa   : > { %1034 = vrsqrt.f32 %v408_v50 }
 0x1b1   : > { %v1029_v51 = vpop.eup %1028 }
 0x1b2   : > { %v1031_v52 = vpop.eup %1030  ;;  %v534_v53 = vmul.f32 14.285714, %v1029_v51 }
 0x1b3   : > { %v411_v55 = vmul.f32 14.285714, %v1031_v52 }
 0x1b4   : > { %v536_v59 = vmul.f32 %v534_v53, %v522_v26 }
 0x1b5   : > { %v413_v61 = vmul.f32 %v411_v55, %v399_v27 }
 0x1b6   : > { %v1033_v54 = vpop.eup %1032 }
 0x1b7   : > { %v1035_v56 = vpop.eup %1034  ;;  %v535_v57 = vmul.f32 14.285714, %v1033_v54 }
 0x1b8   : > { %v412_v58 = vmul.f32 14.285714, %v1035_v56 }
 0x1b9   : > { %v537_v60 = vmul.f32 %v535_v57, %v523_v28  ;;  %v868_v28 = vunpack.c.h.bf16 %v866_v16 }
 0x1ba   : > { %v414_v62 = vmul.f32 %v412_v58, %v400_v31  ;;  %v864_v31 = vunpack.c.h.bf16 %v862_v18 }
 0x1bb   : > { %v538_v63 = vpack.c.bf16 %v537_v60, %v536_v59 }
 0x1bc   : > { %v415_v0 = vpack.c.bf16 %v414_v62, %v413_v61 }
 0x1bd   : > { %900 = vmatmul.mubr.bf16.vlgmr.msra.gmra.mxu1 %v538_v63  ;;  %v618_v21 = vunpack.c.l.bf16 %v538_v63  ;;  %v619_v29 = vunpack.c.h.bf16 %v538_v63 }
 0x1be   : > { %888 = vmatmul.mubr.bf16.vlgmr.msra.gmra.mxu0 %v415_v0  ;;  %v497_v25 = vunpack.c.l.bf16 %v415_v0  ;;  %v498_v32 = vunpack.c.h.bf16 %v415_v0 }
 0x1bf   : > { %v620_v27 = vmul.f32 %v867_v20, %v618_v21  ;;  %v621_v33 = vmul.f32 %v868_v28, %v619_v29 }
 0x1c0   : > { %v499_v30 = vmul.f32 %v863_v24, %v497_v25  ;;  %v500_v34 = vmul.f32 %v864_v31, %v498_v32 }
 0x27d   : > { %v605_v1 = vpop.f32.mrf.mxu1 }
 0x27e   : > { %v482_v2 = vpop.f32.mrf.mxu0  ;;  %v626_v3 = vmul.f32 1.442695, %v605_v1 }
 0x27f   : > { %v505_v4 = vmul.f32 1.442695, %v482_v2  ;;  %v901_v5 = vpop.f32.mrf.mxu1 }
 0x280   : > { %1036 = vpow2.f32 %v626_v3  ;;  %v889_v6 = vpop.f32.mrf.mxu0 }
 0x281   : > { %1038 = vpow2.f32 %v505_v4  ;;  %v608_v7 = vpop.f32.mrf.mxu1 }
 0x282   : > { %v485_v8 = vpop.f32.mrf.mxu0  ;;  %v628_v9 = vmul.f32 1.442695, %v608_v7 }
 0x283   : > { %v507_v10 = vmul.f32 1.442695, %v485_v8  ;;  %v902_v11 = vpop.f32.mrf.mxu1 }
 0x284   : > { %1040 = vpow2.f32 %v628_v9  ;;  %v890_v12 = vpop.f32.mrf.mxu0 }
 0x285   : > { %1042 = vpow2.f32 %v507_v10 }
 0x28d   : > { %v1037_v13 = vpop.eup %1036 }
 0x28e   : > { %v1039_v14 = vpop.eup %1038  ;;  %v630_v15 = vsel %vm509_vm1, %v1037_v13, 0.0 }
 0x28f   : > { %631 = vadd.xlane.f32.xlu1 %v630_v15  ;;  %v510_v17 = vsel %vm509_vm1, %v1039_v14, 0.0 }
 0x290   : > { %511 = vadd.xlane.f32.xlu0 %v510_v17 }
 0x291   : > { %v1041_v19 = vpop.eup %1040 }
 0x292   : > { %v1043_v22 = vpop.eup %1042  ;;  %v633_v23 = vsel %vm509_vm1, %v1041_v19, 0.0 }
 0x293   : > { %634 = vadd.xlane.f32.xlu1 %v633_v23  ;;  %v513_v26 = vsel %vm509_vm1, %v1043_v22, 0.0 }
 0x294   : > { %514 = vadd.xlane.f32.xlu0 %v513_v26 }
 0x297   : > { %622 = vadd.xlane.f32.xlu1 %v620_v27 }
 0x298   : > { %501 = vadd.xlane.f32.xlu0 %v499_v30 }
 0x29b   : > { %624 = vadd.xlane.f32.xlu1 %v621_v33 }
 0x29c   : > { %503 = vadd.xlane.f32.xlu0 %v500_v34 }
 0x318   : > { %v632_v35 = vpop.xlane.xlu1 %631 }
 0x319   : > { %1044 = vlog2.f32 %v632_v35  ;;  %v512_v36 = vpop.xlane.xlu0 %511 }
 0x31a   : > { %1046 = vlog2.f32 %v512_v36 }
 0x31c   : > { %v635_v37 = vpop.xlane.xlu1 %634 }
 0x31d   : > { %1048 = vlog2.f32 %v635_v37  ;;  %v515_v38 = vpop.xlane.xlu0 %514 }
 0x31e   : > { %1050 = vlog2.f32 %v515_v38 }
 0x320   : > { %v623_v40 = vpop.xlane.xlu1 %622 }
 0x321   : > { %v502_v43 = vpop.xlane.xlu0 %501 }
 0x324   : > { %v625_v51 = vpop.xlane.xlu1 %624 }
 0x325   : > { %v504_v54 = vpop.xlane.xlu0 %503 }
 0x326   : > { %v1045_v39 = vpop.eup %1044 }
 0x327   : > { %v1047_v41 = vpop.eup %1046  ;;  %v637_v42 = vmul.f32 0.6931472, %v1045_v39 }
 0x328   : > { %v517_v44 = vmul.f32 0.6931472, %v1047_v41 }
 0x329   : > { %v640_v45 = vsub.f32 %v637_v42, %v623_v40 }
 0x32a   : > { %v1049_v46 = vpop.eup %1048  ;;  %v520_v47 = vsub.f32 %v517_v44, %v502_v43 }
 0x32b   : > { %v1051_v48 = vpop.eup %1050  ;;  %v639_v49 = vmul.f32 0.6931472, %v1049_v46 }
 0x32c   : > { %v642_v50 = vadd.f32 %v640_v45, %v520_v47  ;;  %v519_v52 = vmul.f32 0.6931472, %v1051_v48 }
 0x32d   : > { %v641_v53 = vsub.f32 %v639_v49, %v625_v51 }
 0x32e   : > { %645 = vst.msk [vmem:[%s1473_s13] sm:$0xff] %vm644_vm2, %v642_v50  ;;  %v521_v55 = vsub.f32 %v519_v52, %v504_v54 }
 0x330   : > { %v643_v56 = vadd.f32 %v641_v53, %v521_v55 }
 0x332   : > { %646 = vst.msk [vmem:[%s1473_s13 + $0x8] sm:$0xff] %vm644_vm2, %v643_v56 }
 0x333 PF: > { %s21_s22 = sadd.s32 1, %s1242_s22   ;;  %s1560_s19 = sld [smem:[#allocation15_spill]] }
 0x334   : > { %p18_p10 = scmp.ge.s32.totalorder %s21_s22, 6   ;;  %s1561_s2 = sld [smem:[#allocation16_spill]] }
 0x335   : > { %s1562_s21 = sld [smem:[#allocation17_spill]]  ;;  %s1563_s15 = smov %s1218_s16 }
 0x336   : > { %s1564_s16 = smov %s1222_s17  ;;  %s1565_s17 = smov %s1413_s9 }
 0x337   : > { %s1566_s18 = smov %s1234_s20  ;;  %20 = sbr.rel (!%p18_p10) target bundleno = 12 (0xc), region = 125 }
 0x33a   : > { %s1567_s20 = smov %s1561_s2 }
 0x33c   :  { %675 = vsyncpa [#allocation5], 1 }
 0x33d   :  { %677 = vsyncpa [#allocation5 + $0x1], 1 }
 0x33e   :  { %678 = vsyncpa [#allocation7], 1 }
 0x33f   :  { %680 = vsyncpa [#allocation7 + $0x1], 1 }
 0x340   :  { %681 = vsyncpa [#allocation10], 1 }

</bundles_post_ra>
